<compile_context>
chip_gen: v7x
topology: tpu7x:2x2x1
jax: 0.10.0
libtpu: 0.0.40
codegen_flags: <defaults>
</compile_context>

<pallas_src>
import math
from functools import partial

import jax
import jax.numpy as jnp
from jax.experimental import pallas as pl
from jax.experimental.pallas import tpu as pltpu

_LANE = 128


def _round_up(x, m):
    return ((x + m - 1) // m) * m


# ----------------------------- Pallas kernel ------------------------------ #

def _adaptive_circuit_kernel(x_ref, w1_ref, w2_ref, w3_ref, sp_ref, o_ref, *,
                             true_hidden, n_out):
    """Fused fc1 -> relu -> layernorm -> (dropout=id) -> fc2 -> relu -> fc3 -> sigmoid."""
    x = x_ref[...]                                     # (TB, D_in) bf16, no cast needed

    b1 = sp_ref[0:1, :]                                # packed small params: rows of (8,128) slab
    gamma = sp_ref[1:2, :]
    beta = sp_ref[2:3, :]
    b2 = sp_ref[3:4, :]
    b3 = sp_ref[4:5, :]

    # fc1 + ReLU  (bf16 MXU operands, f32 accumulation; K = true input dim)
    h = jnp.dot(x, w1_ref[...], preferred_element_type=jnp.float32) + b1
    h = jnp.maximum(h, 0.0)                            # padded hidden lanes stay exactly 0

    # LayerNorm (eps=1e-5) over the TRUE hidden width, single fused stats pass.
    # Padded lanes are exactly zero, so sums over the padded row equal sums over
    # the true width; divide by true_hidden (not the padded width).
    # TODO(synk): switch to two-pass variance if tolerances tighten below ~1e-3.
    inv_h = jnp.float32(1.0 / true_hidden)
    s1 = jnp.sum(h, axis=-1, keepdims=True)
    s2 = jnp.sum(h * h, axis=-1, keepdims=True)
    mu = s1 * inv_h
    var = s2 * inv_h - mu * mu
    hn = (h - mu) * jax.lax.rsqrt(var + 1e-5)
    hn = hn * gamma + beta                             # padded gamma/beta == 0 -> lanes back to 0

    # dropout(p=0.1): identity in inference mode (deterministic kernel)
    # TODO(synk): training-mode dropout would need pltpu.prng_seed/prng_random_bits.

    # fc2 + ReLU
    h2 = jnp.dot(hn.astype(jnp.bfloat16), w2_ref[...],
                 preferred_element_type=jnp.float32) + b2
    h2 = jnp.maximum(h2, 0.0)

    # fc3 + sigmoid, narrowed to the true output width before the transcendentals
    # and the store (16x fewer output HBM bytes; exp + approx reciprocal on EUP).
    logits = jnp.dot(h2.astype(jnp.bfloat16), w3_ref[...],
                     preferred_element_type=jnp.float32) + b3
    ln = logits[:, :n_out]
    o_ref[...] = pl.reciprocal(1.0 + jnp.exp(-ln), approx=True)


# ------------------------------- wrapper ----------------------------------- #

@partial(jax.jit, static_argnames=("num_bn_nodes", "hidden_dim"))
def adaptive_circuit_forward(x, kb_feat, params, num_bn_nodes, hidden_dim):
    """x: (batch, num_bn_nodes) f32, kb_feat: (batch, embedding_dim) f32."""
    w1p, w2p, w3p, small = params                      # bf16 weights + (8,128) f32 slab
    batch = x.shape[0]
    d_in, h_pad = w1p.shape
    n_out = num_bn_nodes

    # Single producer op: concat + bf16 cast fused by XLA.  No padding pass, no
    # extra f32 copy of the activations in HBM.
    combined = jnp.concatenate(
        [x.astype(jnp.bfloat16), kb_feat.astype(jnp.bfloat16)], axis=1)
    assert combined.shape[1] == d_in

    # Batch tile: multiple of 16 (bf16 sublane packing); sized so nontrivial
    # batches give >= 2 grid steps (v7x megacore via "parallel"), capped at 1024
    # (near HBM roofline on v6e, tiny vs VMEM on every generation).  Ragged tail
    # is handled by Pallas (reads padded, out-of-bounds output rows masked).
    tb = max(16, min(1024, _round_up(-(-batch // 2), 16)))
    grid = (pl.cdiv(batch, tb),)

    rows = grid[0] * tb
    flops = 2 * rows * (d_in * h_pad + h_pad * h_pad + h_pad * h_pad)
    transcendentals = rows * (n_out + 2)               # exp row + rsqrt + reciprocal
    bytes_accessed = (combined.size * 2
                      + (w1p.size + w2p.size + w3p.size) * 2
                      + small.size * 4 + rows * n_out * 4)

    kernel = partial(_adaptive_circuit_kernel, true_hidden=hidden_dim, n_out=n_out)

    out = pl.pallas_call(
        kernel,
        out_shape=jax.ShapeDtypeStruct((batch, n_out), jnp.float32),
        grid_spec=pltpu.PrefetchScalarGridSpec(
            num_scalar_prefetch=0,
            grid=grid,
            in_specs=[
                pl.BlockSpec((tb, d_in), lambda i: (i, 0)),        # activations: tiled, bf16
                pl.BlockSpec(w1p.shape, lambda i: (0, 0)),         # weights: resident in VMEM
                pl.BlockSpec(w2p.shape, lambda i: (0, 0)),
                pl.BlockSpec(w3p.shape, lambda i: (0, 0)),
                pl.BlockSpec(small.shape, lambda i: (0, 0)),       # packed biases/LN params
            ],
            out_specs=pl.BlockSpec((tb, n_out), lambda i: (i, 0)), # narrow output, no slice pass
        ),
        compiler_params=pltpu.CompilerParams(
            dimension_semantics=("parallel",)),
        cost_estimate=pl.CostEstimate(
            flops=flops, transcendentals=transcendentals,
            bytes_accessed=bytes_accessed),
    )(combined, w1p, w2p, w3p, small)

    return out


# --------------------------- parameter construction ------------------------ #

def build_params_and_kb(key, num_bn_nodes, embedding_dim, hidden_dim,
                        num_kb_embeddings, priors):
    """Deterministic synthetic parameters mirroring AdaptiveCircuit.__init__,
    returned both as kernel params (hidden dims lane-padded) and unpadded
    reference params."""
    ks = jax.random.split(key, 4)
    fc1_in = num_bn_nodes + embedding_dim
    half = hidden_dim // 2

    def init_w(k, fan_in, fan_out):
        scale = math.sqrt(2.0 / (fan_in + fan_out))
        return (scale * jax.random.normal(k, (fan_in, fan_out))).astype(jnp.float32)

    w1 = init_w(ks[0], fc1_in, hidden_dim)
    b1 = jnp.zeros((hidden_dim,), jnp.float32)
    gamma = jnp.ones((hidden_dim,), jnp.float32)
    beta = jnp.zeros((hidden_dim,), jnp.float32)
    w2 = init_w(ks[1], hidden_dim, half)
    b2 = jnp.zeros((half,), jnp.float32)
    w3 = init_w(ks[2], half, num_bn_nodes)

    # fc3 bias initialized from Bayesian-network priors: logit(clamped prior)
    bias_vals = []
    for i in range(num_bn_nodes):
        p = max(0.01, min(0.99, float(priors[i])))
        bias_vals.append(math.log(p / (1.0 - p)))
    b3 = jnp.asarray(bias_vals, jnp.float32)

    # KB embedding table (synthetic, deterministic)
    kb_embedding = jax.random.normal(
        ks[3], (num_kb_embeddings, embedding_dim)).astype(jnp.float32)

    # ---- kernel packing: hidden dims padded to 128 lanes, input dim NOT padded ----
    assert hidden_dim <= _LANE and half <= _LANE and num_bn_nodes <= _LANE, \
        "small-param slab packing assumes all hidden/output widths fit in one lane tile"
    h_pad = _round_up(hidden_dim, _LANE)
    half_pad = _round_up(half, _LANE)
    n_pad = _round_up(num_bn_nodes, _LANE)

    w1p = jnp.zeros((fc1_in, h_pad), jnp.float32).at[:, :hidden_dim].set(w1)
    w2p = jnp.zeros((h_pad, half_pad), jnp.float32).at[:hidden_dim, :half].set(w2)
    w3p = jnp.zeros((half_pad, n_pad), jnp.float32).at[:half, :num_bn_nodes].set(w3)

    small = jnp.zeros((8, h_pad), jnp.float32)         # rows: b1, gamma, beta, b2, b3
    small = small.at[0, :hidden_dim].set(b1)
    small = small.at[1, :hidden_dim].set(gamma)
    small = small.at[2, :hidden_dim].set(beta)
    small = small.at[3, :half].set(b2)
    small = small.at[4, :num_bn_nodes].set(b3)

    kernel_params = (w1p.astype(jnp.bfloat16), w2p.astype(jnp.bfloat16),
                     w3p.astype(jnp.bfloat16), small)
    ref_params = (w1, b1, gamma, beta, w2, b2, w3, b3)
    return kernel_params, ref_params, kb_embedding


def kb_features_for_input(kb_embedding, related_indices, batch_size):
    """Mean of related-entity embeddings, broadcast over batch (JAX glue)."""
    emb = kb_embedding[jnp.asarray(related_indices, jnp.int32)]     # (R, E)
    aggregated = jnp.mean(emb, axis=0, keepdims=True)               # (1, E)
    return jnp.broadcast_to(aggregated, (batch_size, emb.shape[1]))


def reference_forward(combined, ref_params):
    """Pure-JAX f32 reference of the module's forward (inference mode)."""
    w1, b1, gamma, beta, w2, b2, w3, b3 = ref_params
    h = jax.nn.relu(combined @ w1 + b1)
    mu = jnp.mean(h, axis=-1, keepdims=True)
    var = jnp.mean((h - mu) ** 2, axis=-1, keepdims=True)
    h = (h - mu) / jnp.sqrt(var + 1e-5) * gamma + beta
    h2 = jax.nn.relu(h @ w2 + b2)
    return jax.nn.sigmoid(h2 @ w3 + b3)


# ---------------------------------- main ----------------------------------- #

if __name__ == "__main__":
    # Small, forward-consistent shapes
    batch = 2
    num_bn_nodes = 8        # number of Bayesian-network nodes
    embedding_dim = 32      # KB embedding dim
    hidden_dim = 32         # adaptive_circuit.hidden_dim
    num_kb_embeddings = 16

    key = jax.random.PRNGKey(0)
    k_in, k_par = jax.random.split(key)

    # synthetic BN priors for fc3 bias init (one per node)
    priors = [0.5, 0.2, 0.8, 0.35, 0.65, 0.1, 0.9, 0.45]

    params, ref_params, kb_embedding = build_params_and_kb(
        k_par, num_bn_nodes, embedding_dim, hidden_dim,
        num_kb_embeddings, priors)

    # input x: (batch, num_bn_nodes)
    x = jax.random.uniform(k_in, (batch, num_bn_nodes), dtype=jnp.float32)

    # KB-derived features: mean of a few "related entity" embeddings
    related_entity_indices = [0, 2, 5]
    kb_feat = kb_features_for_input(kb_embedding, related_entity_indices, batch)

    out = adaptive_circuit_forward(x, kb_feat, params, num_bn_nodes, hidden_dim)
    jax.block_until_ready(out)

    assert out.shape == (batch, num_bn_nodes)
    assert bool(jnp.all((out >= 0.0) & (out <= 1.0)))

    # sanity check vs pure-JAX f32 reference (bf16 matmul operands -> loose tol)
    combined_f32 = jnp.concatenate([x, kb_feat], axis=1)
    ref = reference_forward(combined_f32, ref_params)
    max_err = float(jnp.max(jnp.abs(out - ref)))
    assert max_err < 5e-2, f"mismatch vs reference: {max_err}"

    print("KERNEL_OK")
</pallas_src>

<mosaic_0001>
module attributes {stable_mosaic.version = 11 : i64} {
  func.func @_adaptive_circuit_kernel(%arg0: i32, %arg1: memref<16x40xbf16, #tpu.memory_space<vmem>>, %arg2: memref<40x128xbf16, #tpu.memory_space<vmem>>, %arg3: memref<128x128xbf16, #tpu.memory_space<vmem>>, %arg4: memref<128x128xbf16, #tpu.memory_space<vmem>>, %arg5: memref<8x128xf32, #tpu.memory_space<vmem>>, %arg6: memref<16x8xf32, #tpu.memory_space<vmem>>) attributes {dimension_semantics = [#tpu.dimension_semantics<parallel>], iteration_bounds = array<i64: 1>, scalar_prefetch = 0 : i64, scratch_operands = 0 : i64, tpu.core_type = #tpu.core_type<tc>, window_params = [{transform_indices = @transform_0, window_bounds = array<i64: 16, 40>}, {pipeline_mode = #tpu.pipeline_mode<synchronous>, transform_indices = @transform_1, window_bounds = array<i64: 40, 128>}, {pipeline_mode = #tpu.pipeline_mode<synchronous>, transform_indices = @transform_2, window_bounds = array<i64: 128, 128>}, {pipeline_mode = #tpu.pipeline_mode<synchronous>, transform_indices = @transform_3, window_bounds = array<i64: 128, 128>}, {pipeline_mode = #tpu.pipeline_mode<synchronous>, transform_indices = @transform_4, window_bounds = array<i64: 8, 128>}, {transform_indices = @transform_5, window_bounds = array<i64: 16, 8>}]} {
    %c0 = arith.constant 0 : index
    %c0_0 = arith.constant 0 : index
    %0 = vector.load %arg1[%c0, %c0_0] : memref<16x40xbf16, #tpu.memory_space<vmem>>, vector<16x40xbf16>
    %c0_1 = arith.constant 0 : index
    %c0_2 = arith.constant 0 : index
    %1 = vector.load %arg5[%c0_1, %c0_2] : memref<8x128xf32, #tpu.memory_space<vmem>>, vector<1x128xf32>
    %c1 = arith.constant 1 : index
    %c0_3 = arith.constant 0 : index
    %2 = vector.load %arg5[%c1, %c0_3] : memref<8x128xf32, #tpu.memory_space<vmem>>, vector<1x128xf32>
    %c2 = arith.constant 2 : index
    %c0_4 = arith.constant 0 : index
    %3 = vector.load %arg5[%c2, %c0_4] : memref<8x128xf32, #tpu.memory_space<vmem>>, vector<1x128xf32>
    %c3 = arith.constant 3 : index
    %c0_5 = arith.constant 0 : index
    %4 = vector.load %arg5[%c3, %c0_5] : memref<8x128xf32, #tpu.memory_space<vmem>>, vector<1x128xf32>
    %c4 = arith.constant 4 : index
    %c0_6 = arith.constant 0 : index
    %5 = vector.load %arg5[%c4, %c0_6] : memref<8x128xf32, #tpu.memory_space<vmem>>, vector<1x128xf32>
    %c0_7 = arith.constant 0 : index
    %c0_8 = arith.constant 0 : index
    %6 = vector.load %arg2[%c0_7, %c0_8] : memref<40x128xbf16, #tpu.memory_space<vmem>>, vector<40x128xbf16>
    %cst = arith.constant dense<0.000000e+00> : vector<16x128xf32>
    %7 = tpu.matmul %0, %6, %cst {dimension_numbers = #tpu.dot_dimension_numbers<[1], [0], [0], [1], [0, 0, 1, 1], [], []>} : vector<16x40xbf16>, vector<40x128xbf16>, vector<16x128xf32> -> vector<16x128xf32>
    %8 = vector.broadcast %1 : vector<1x128xf32> to vector<16x128xf32>
    %9 = arith.addf %7, %8 : vector<16x128xf32>
    %cst_9 = arith.constant 0.000000e+00 : f32
    %10 = vector.broadcast %cst_9 : f32 to vector<16x128xf32>
    %11 = arith.maximumf %9, %10 : vector<16x128xf32>
    %cst_10 = arith.constant dense<0.000000e+00> : vector<16xf32>
    %12 = vector.multi_reduction <add>, %11, %cst_10 [1] : vector<16x128xf32> to vector<16xf32>
    %13 = vector.shape_cast %12 : vector<16xf32> to vector<16x1xf32>
    %14 = arith.mulf %11, %11 : vector<16x128xf32>
    %cst_11 = arith.constant dense<0.000000e+00> : vector<16xf32>
    %15 = vector.multi_reduction <add>, %14, %cst_11 [1] : vector<16x128xf32> to vector<16xf32>
    %16 = vector.shape_cast %15 : vector<16xf32> to vector<16x1xf32>
    %cst_12 = arith.constant 3.125000e-02 : f32
    %17 = vector.broadcast %cst_12 : f32 to vector<16x1xf32>
    %18 = arith.mulf %13, %17 : vector<16x1xf32>
    %cst_13 = arith.constant 3.125000e-02 : f32
    %19 = vector.broadcast %cst_13 : f32 to vector<16x1xf32>
    %20 = arith.mulf %16, %19 : vector<16x1xf32>
    %21 = arith.mulf %18, %18 : vector<16x1xf32>
    %22 = arith.subf %20, %21 : vector<16x1xf32>
    %23 = vector.broadcast %18 : vector<16x1xf32> to vector<16x128xf32>
    %24 = arith.subf %11, %23 : vector<16x128xf32>
    %cst_14 = arith.constant 9.99999974E-6 : f32
    %25 = vector.broadcast %cst_14 : f32 to vector<16x1xf32>
    %26 = arith.addf %22, %25 : vector<16x1xf32>
    %27 = math.rsqrt %26 : vector<16x1xf32>
    %28 = vector.broadcast %27 : vector<16x1xf32> to vector<16x128xf32>
    %29 = arith.mulf %24, %28 : vector<16x128xf32>
    %30 = vector.broadcast %2 : vector<1x128xf32> to vector<16x128xf32>
    %31 = arith.mulf %29, %30 : vector<16x128xf32>
    %32 = vector.broadcast %3 : vector<1x128xf32> to vector<16x128xf32>
    %33 = arith.addf %31, %32 : vector<16x128xf32>
    %34 = arith.truncf %33 : vector<16x128xf32> to vector<16x128xbf16>
    %c0_15 = arith.constant 0 : index
    %c0_16 = arith.constant 0 : index
    %35 = vector.load %arg3[%c0_15, %c0_16] : memref<128x128xbf16, #tpu.memory_space<vmem>>, vector<128x128xbf16>
    %cst_17 = arith.constant dense<0.000000e+00> : vector<16x128xf32>
    %36 = tpu.matmul %34, %35, %cst_17 {dimension_numbers = #tpu.dot_dimension_numbers<[1], [0], [0], [1], [0, 0, 1, 1], [], []>} : vector<16x128xbf16>, vector<128x128xbf16>, vector<16x128xf32> -> vector<16x128xf32>
    %37 = vector.broadcast %4 : vector<1x128xf32> to vector<16x128xf32>
    %38 = arith.addf %36, %37 : vector<16x128xf32>
    %cst_18 = arith.constant 0.000000e+00 : f32
    %39 = vector.broadcast %cst_18 : f32 to vector<16x128xf32>
    %40 = arith.maximumf %38, %39 : vector<16x128xf32>
    %41 = arith.truncf %40 : vector<16x128xf32> to vector<16x128xbf16>
    %c0_19 = arith.constant 0 : index
    %c0_20 = arith.constant 0 : index
    %42 = vector.load %arg4[%c0_19, %c0_20] : memref<128x128xbf16, #tpu.memory_space<vmem>>, vector<128x128xbf16>
    %cst_21 = arith.constant dense<0.000000e+00> : vector<16x128xf32>
    %43 = tpu.matmul %41, %42, %cst_21 {dimension_numbers = #tpu.dot_dimension_numbers<[1], [0], [0], [1], [0, 0, 1, 1], [], []>} : vector<16x128xbf16>, vector<128x128xbf16>, vector<16x128xf32> -> vector<16x128xf32>
    %44 = vector.broadcast %5 : vector<1x128xf32> to vector<16x128xf32>
    %45 = arith.addf %43, %44 : vector<16x128xf32>
    %46 = vector.extract_strided_slice %45 {offsets = [0, 0], sizes = [16, 8], strides = [1, 1]} : vector<16x128xf32> to vector<16x8xf32>
    %cst_22 = arith.constant 0.000000e+00 : f32
    %47 = vector.broadcast %cst_22 : f32 to vector<16x8xf32>
    %48 = arith.subf %47, %46 : vector<16x8xf32>
    %49 = math.exp %48 : vector<16x8xf32>
    %cst_23 = arith.constant 1.000000e+00 : f32
    %50 = vector.broadcast %cst_23 : f32 to vector<16x8xf32>
    %51 = arith.addf %50, %49 : vector<16x8xf32>
    %52 = tpu.reciprocal %51 {approx = true} : vector<16x8xf32> -> vector<16x8xf32>
    %c0_24 = arith.constant 0 : index
    %c0_25 = arith.constant 0 : index
    %53 = vector.load %arg6[%c0_24, %c0_25] : memref<16x8xf32, #tpu.memory_space<vmem>>, vector<16x8xf32>
    tpu.vector_store %arg6[%c0_24, %c0_25], %52 {strides = array<i32>} : memref<16x8xf32, #tpu.memory_space<vmem>>, vector<16x8xf32>,
    return
  }
  func.func @transform_0(%arg0: i32) -> (i32, i32) {
    %c0_i32 = arith.constant 0 : i32
    %c0_i32_0 = arith.constant 0 : i32
    return %arg0, %c0_i32 : i32, i32
  }
  func.func @transform_1(%arg0: i32) -> (i32, i32) {
    %c0_i32 = arith.constant 0 : i32
    %c0_i32_0 = arith.constant 0 : i32
    %c0_i32_1 = arith.constant 0 : i32
    return %c0_i32, %c0_i32_0 : i32, i32
  }
  func.func @transform_2(%arg0: i32) -> (i32, i32) {
    %c0_i32 = arith.constant 0 : i32
    %c0_i32_0 = arith.constant 0 : i32
    %c0_i32_1 = arith.constant 0 : i32
    return %c0_i32, %c0_i32_0 : i32, i32
  }
  func.func @transform_3(%arg0: i32) -> (i32, i32) {
    %c0_i32 = arith.constant 0 : i32
    %c0_i32_0 = arith.constant 0 : i32
    %c0_i32_1 = arith.constant 0 : i32
    return %c0_i32, %c0_i32_0 : i32, i32
  }
  func.func @transform_4(%arg0: i32) -> (i32, i32) {
    %c0_i32 = arith.constant 0 : i32
    %c0_i32_0 = arith.constant 0 : i32
    %c0_i32_1 = arith.constant 0 : i32
    return %c0_i32, %c0_i32_0 : i32, i32
  }
  func.func @transform_5(%arg0: i32) -> (i32, i32) {
    %c0_i32 = arith.constant 0 : i32
    %c0_i32_0 = arith.constant 0 : i32
    return %arg0, %c0_i32 : i32, i32
  }
}

</mosaic_0001>

<bundles_post_ra>
// kernel: adaptive_circuit_forward.1
= control target key start
LH: loop header
LB: loop body
LE: loop exit
PB: predicated region body
PF: predicated region fallthrough
CT: control target
= control target key end

     0   :  { %10 = vsyncpa [#allocation3], 0  ;;  %s913_s0 = inlined_call_operand.vmem [shape: bf16[2,40], index: 0, kind: input, shape index: {}]   ;;  %s914_s1 = inlined_call_operand.hbm [shape: bf16[40,128], index: 1, kind: input, shape index: {}]   ;;  %s915_s2 = inlined_call_operand.hbm [shape: bf16[128,128], index: 2, kind: input, shape index: {}]   ;;  %s916_s3 = inlined_call_operand.hbm [shape: bf16[128,128], index: 3, kind: input, shape index: {}]   ;;  %s917_s4 = inlined_call_operand.vmem [shape: f32[8,128], index: 4, kind: input, shape index: {}]   ;;  %s918_s5 = inlined_call_operand.hbm [shape: f32[2,8], index: 5, kind: output, shape index: {}]  }
   0x1   :  { %11 = vsyncpa [#allocation6], 0 }
   0x2   :  { %12 = vsyncpa [#allocation4], 0  ;;  %s732_s18 = smov [#allocation5]   ;;  %s733_s20 = smov [#allocation2]  }
   0x3   :  { %s32_s19 = sshll.u32 %s732_s18, 4  ;;  %s20_s21 = sshll.u32 %s733_s20, 4  ;;  %s33_s19 = int_to_ptr.vmem [resolvable:$true] %s32_s19  ;;  %s773_s21 = int_to_ptr.vmem [resolvable:$true] %s20_s21 }
   0x4   :  { %s638_s24 = scalar_lea.hbm %s915_s2, 1024 }
   0x5   :  { %p639_p0 = scmp.ne.s32.totalorder %s915_s2, %s638_s24  ;;  %p642_p1 = scmp.lt.u32.totalorder %s638_s24, %s915_s2 }
   0x7   :  { %p644_p2 = pnand %p642_p1, %p639_p0 }
   0x9   :  { %647 = shalt.err (!%p644_p2)
}
   0xa   :  { %s648_s29 = scalar_lea.vmem %s33_s19, 1024  ;;  %p653_p4 = scmp.lt.s32.totalorder %s33_s19, %s33_s19 }
   0xb   :  { %p649_p3 = scmp.ne.s32.totalorder %s33_s19, %s648_s29  ;;  %p654_p5 = scmp.lt.s32.totalorder %s648_s29, %s648_s29 }
   0xd   :  { %p655_p6 = por %p654_p5, %p653_p4 }
   0xf   :  { %p656_p7 = pnand %p655_p6, %p649_p3 }
  0x11   :  { %659 = shalt.err (!%p656_p7)
}
  0x12   :  { %s734_s30 = smov 64   ;;  %s735_s6 = smov 4  }
  0x13   :  { %38 = dma.hbm_to_vmem [thread:$0]  %s915_s2, 1024, %s33_s19, [#allocation6], %s734_s30, %s734_s30, %s735_s6  }
  0x14   :  { %s660_s11 = scalar_lea.hbm %s914_s1, 320 }
  0x15   :  { %p661_p8 = scmp.ne.s32.totalorder %s914_s1, %s660_s11  ;;  %p664_p9 = scmp.lt.u32.totalorder %s660_s11, %s914_s1 }
  0x17   :  { %p666_p10 = pnand %p664_p9, %p661_p8 }
  0x19   :  { %669 = shalt.err (!%p666_p10)
}
  0x1a   :  { %s670_s16 = scalar_lea.vmem %s773_s21, 320  ;;  %p675_p12 = scmp.lt.s32.totalorder %s773_s21, %s773_s21 }
  0x1b   :  { %p671_p11 = scmp.ne.s32.totalorder %s773_s21, %s670_s16  ;;  %p676_p13 = scmp.lt.s32.totalorder %s670_s16, %s670_s16 }
  0x1d   :  { %p677_p0 = por %p676_p13, %p675_p12 }
  0x1f   :  { %p678_p1 = pnand %p677_p0, %p671_p11 }
  0x21   :  { %681 = shalt.err (!%p678_p1)
}
  0x22   :  { %26 = dma.hbm_to_vmem [thread:$0]  %s914_s1, 320, %s773_s21, [#allocation3], %s734_s30, %s734_s30, %s735_s6  }
  0x23   :  { %s736_s18 = smov [#allocation7]   ;;  %s682_s23 = scalar_lea.hbm %s916_s3, 1024 }
  0x24   :  { %s44_s19 = sshll.u32 %s736_s18, 4  ;;  %p683_p2 = scmp.ne.s32.totalorder %s916_s3, %s682_s23  ;;  %s45_s19 = int_to_ptr.vmem [resolvable:$true] %s44_s19 }
  0x25   :  { %p686_p3 = scmp.lt.u32.totalorder %s682_s23, %s916_s3 }
  0x27   :  { %p688_p4 = pnand %p686_p3, %p683_p2 }
  0x29   :  { %691 = shalt.err (!%p688_p4)
}
  0x2a   :  { %s692_s28 = scalar_lea.vmem %s45_s19, 1024  ;;  %p697_p6 = scmp.lt.s32.totalorder %s45_s19, %s45_s19 }
  0x2b   :  { %p693_p5 = scmp.ne.s32.totalorder %s45_s19, %s692_s28  ;;  %p698_p7 = scmp.lt.s32.totalorder %s692_s28, %s692_s28 }
  0x2d   :  { %p699_p8 = por %p698_p7, %p697_p6 }
  0x2f   :  { %p700_p9 = pnand %p699_p8, %p693_p5 }
  0x31   :  { %703 = shalt.err (!%p700_p9)
}
  0x32   :  { %50 = dma.hbm_to_vmem [thread:$0]  %s916_s3, 1024, %s45_s19, [#allocation6], %s734_s30, %s734_s30, %s735_s6  }
  0x33   :  { %726 = dma.done.wait [#allocation3], 320  }
  0x34   :  { %727 = vsyncadd [#allocation3], 4294966976 }
  0x35   :  { %728 = dma.done.wait [#allocation6], 2048  }
  0x36   :  { %729 = vsyncadd [#allocation6], 4294965248  ;;  %v737_v0 = vmov 0.0   ;;  %vm738_vm0 = vmmov 0   ;;  %v100_v1 = vlaneseq  ;;  %v739_v2 = vmov 1966171168  }
  0x37   :  { %546 = vmatprep.subr.bf16.mxu0 %v737_v0  ;;  %552 = vmatprep.mubr.msk.bf16.mxu0 %vm738_vm0, %v737_v0  ;;  %v98_v3 = vunpack.c.l.s4 %v739_v2  ;;  %v607_v6 = vld [vmem:[#allocation2] sm:$0xff]   ;;  %v608_v7 = vld [vmem:[#allocation2 + $0x8] sm:$0xff]   ;;  %vm161_vm1 = vcmask 1043456   ;;  %v609_v8 = vld [vmem:[#allocation2 + $0x10] ss:$0 sps:$4 sm:$0xff]   ;;  %vm157_vm2 = vcmask 326656  }
  0x38   :  { %556 = vmatprep.subr.bf16.mxu1 %v737_v0  ;;  %572 = vmatprep.mubr.msk.bf16.mxu1 %vm738_vm0, %v737_v0  ;;  %v101_v5 = vshrl.u32 %v100_v1, 7  ;;  %v63_v9 = vld [vmem:[%s913_s0] sm:$0x1]  ;;  %v64_v11 = vld [vmem:[%s913_s0 + $0x1] sm:$0x1]  ;;  %v163_v18 = vsel %vm161_vm1, %v609_v8, 0 }
  0x39   :  { %v99_v4 = vunpack.c.0.s8 %v98_v3  ;;  %547 = vmatpush3.bf16.msra.mxu0 %v607_v6  ;;  %v65_v12 = vld [vmem:[%s913_s0 + $0x2] sm:$0x1]  ;;  %v66_v13 = vld [vmem:[%s913_s0 + $0x3] sm:$0x1]  ;;  %v67_v14 = vld [vmem:[%s913_s0 + $0x4] sm:$0x1]  ;;  %v93_v16 = vcombine.low %v63_v9, %v64_v11 }
  0x3a   :  { %548 = vmatprep.subr.bf16.mxu0 %v737_v0  ;;  %v68_v15 = vld [vmem:[%s913_s0 + $0x5] sm:$0x1]  ;;  %v94_v17 = vcombine.low %v65_v12, %v66_v13  ;;  %v69_v19 = vld [vmem:[%s913_s0 + $0x6] sm:$0x1]  ;;  %v70_v20 = vld [vmem:[%s913_s0 + $0x7] sm:$0x1] }
  0x3b   :  { %v102_v10 = vsub.s32 %v99_v4, %v101_v5  ;;  %v95_v21 = vcombine.low %v67_v14, %v68_v15  ;;  %v96_v22 = vcombine.low %v69_v19, %v70_v20  ;;  %v499_v32 = vld [vmem:[%s917_s4] ss:$0 sm:$0xff]  ;;  %v611_v44 = vld [vmem:[#allocation5 + $0x8] sm:$0xff]   ;;  %v612_v45 = vld [vmem:[#allocation5 + $0x10] sm:$0xff]   ;;  %vm478_vm3 = vcmask 64512  }
  0x3c   :  { %v610_v43 = vld [vmem:[#allocation5] sm:$0xff]   ;;  %v613_v46 = vld [vmem:[#allocation5 + $0x18] sm:$0xff]   ;;  %v615_v48 = vld [vmem:[#allocation5 + $0x28] sm:$0xff]  }
  0x3d   :  { %549 = vmatpush3.bf16.msra.mxu0 %v608_v7  ;;  %v103_v23 = vrot.slane %v93_v16, %v102_v10  ;;  %v110_v24 = vrot.slane %v94_v17, %v102_v10  ;;  %v117_v25 = vrot.slane %v95_v21, %v102_v10  ;;  %v124_v26 = vrot.slane %v96_v22, %v102_v10  ;;  %v614_v47 = vld [vmem:[#allocation5 + $0x20] sm:$0xff]   ;;  %v616_v49 = vld [vmem:[#allocation5 + $0x30] sm:$0xff]   ;;  %v617_v50 = vld [vmem:[#allocation5 + $0x38] sm:$0xff]  }
  0x3e   :  { %550 = vmatprep.subr.bf16.mxu0 %v737_v0  ;;  %557 = vmatpush3.bf16.msra.mxu1 %v610_v43  ;;  %v618_v51 = vld [vmem:[#allocation7] sm:$0xff]   ;;  %v619_v52 = vld [vmem:[#allocation7 + $0x8] sm:$0xff]   ;;  %v620_v53 = vld [vmem:[#allocation7 + $0x10] sm:$0xff]  }
  0x3f   :  { %v125_v27 = vcombine.low %v103_v23, %v110_v24  ;;  %v126_v28 = vcombine.low %v117_v25, %v124_v26  ;;  %558 = vmatprep.subr.bf16.mxu1 %v737_v0  ;;  %v621_v54 = vld [vmem:[#allocation7 + $0x18] sm:$0xff]   ;;  %v622_v55 = vld [vmem:[#allocation7 + $0x20] sm:$0xff]   ;;  %v623_v56 = vld [vmem:[#allocation7 + $0x28] sm:$0xff]  }
  0x40   :  { %v504_v11 = vld [vmem:[%s917_s4 + $0x1] ss:$0 sm:$0xff]  ;;  %v505_v16 = vld [vmem:[%s917_s4 + $0x2] ss:$0 sm:$0xff]  ;;  %v624_v21 = vld [vmem:[#allocation7 + $0x30] sm:$0xff]  }
  0x41   :  { %551 = vmatpush3.bf16.msra.mxu0 %v163_v18  ;;  %v133_v29 = vrot.slane %v125_v27, %v102_v10  ;;  %v140_v30 = vrot.slane %v126_v28, %v102_v10  ;;  %v625_v22 = vld [vmem:[#allocation7 + $0x38] sm:$0xff]   ;;  %v506_v23 = vld [vmem:[%s917_s4 + $0x3] ss:$0 sm:$0xff] }
  0x42   :  { %576 = vmatprep.subr.bf16.mxu0 %v737_v0  ;;  %559 = vmatpush3.bf16.msra.mxu1 %v611_v44 }
  0x43   :  { %v141_v31 = vcombine.low %v133_v29, %v140_v30  ;;  %560 = vmatprep.subr.bf16.mxu1 %v737_v0 }
  0x45   :  { %553 = vmatmul.mubr.msk.bf16.vlgmr.msra.gmra.mrb[0].mxu0 %vm157_vm2, %v141_v31 }
  0x46   :  { %592 = vmatprep.mubr.msk.bf16.mxu0 %vm738_vm0, %v737_v0  ;;  %561 = vmatpush3.bf16.msra.mxu1 %v612_v45 }
  0x47   :  { %562 = vmatprep.subr.bf16.mxu1 %v737_v0  ;;  %577 = vmatpush3.bf16.msra.mxu0 %v618_v51 }
  0x48   :  { %578 = vmatprep.subr.bf16.mxu0 %v737_v0 }
  0x4a   :  { %563 = vmatpush3.bf16.msra.mxu1 %v613_v46 }
  0x4b   :  { %564 = vmatprep.subr.bf16.mxu1 %v737_v0  ;;  %579 = vmatpush3.bf16.msra.mxu0 %v619_v52 }
  0x4c   :  { %580 = vmatprep.subr.bf16.mxu0 %v737_v0 }
  0x4e   :  { %565 = vmatpush3.bf16.msra.mxu1 %v614_v47 }
  0x4f   :  { %566 = vmatprep.subr.bf16.mxu1 %v737_v0  ;;  %581 = vmatpush3.bf16.msra.mxu0 %v620_v53 }
  0x50   :  { %582 = vmatprep.subr.bf16.mxu0 %v737_v0 }
  0x52   :  { %567 = vmatpush3.bf16.msra.mxu1 %v615_v48 }
  0x53   :  { %568 = vmatprep.subr.bf16.mxu1 %v737_v0  ;;  %583 = vmatpush3.bf16.msra.mxu0 %v621_v54 }
  0x54   :  { %584 = vmatprep.subr.bf16.mxu0 %v737_v0 }
  0x56   :  { %569 = vmatpush3.bf16.msra.mxu1 %v616_v49 }
  0x57   :  { %570 = vmatprep.subr.bf16.mxu1 %v737_v0  ;;  %585 = vmatpush3.bf16.msra.mxu0 %v622_v55 }
  0x58   :  { %586 = vmatprep.subr.bf16.mxu0 %v737_v0 }
  0x5a   :  { %571 = vmatpush3.bf16.msra.mxu1 %v617_v50 }
  0x5b   :  { %587 = vmatpush3.bf16.msra.mxu0 %v623_v56 }
  0x5c   :  { %588 = vmatprep.subr.bf16.mxu0 %v737_v0 }
  0x5f   :  { %589 = vmatpush3.bf16.msra.mxu0 %v624_v21 }
  0x60   :  { %590 = vmatprep.subr.bf16.mxu0 %v737_v0  ;;  %v515_v0 = vld [vmem:[%s917_s4 + $0x4] ss:$0 sm:$0xff] }
  0x63   :  { %591 = vmatpush3.bf16.msra.mxu0 %v625_v22 }
 0x118   :  { %v199_v33 = vpop.f32.mrb[0].mxu0 }
 0x119   :  { %v200_v34 = vadd.f32 %v499_v32, %v199_v33  ;;  %v554_v35 = vpop.f32.mrb[1].mxu0 }
 0x11a   :  { %v202_v36 = vpop.f32.mrb[2].mxu0 }
 0x11b   :  { %v863_v37 = vmax.f32 %v200_v34, 0.0  ;;  %v203_v38 = vadd.f32 %v499_v32, %v202_v36  ;;  %v555_v39 = vpop.f32.mrb[3].mxu0 }
 0x11d   :  { %v865_v40 = vmax.f32 %v203_v38, 0.0  ;;  %208 = vadd.xlane.f32.xlu0 %v863_v37  ;;  %v212_v41 = vmul.f32 %v863_v37, %v863_v37 }
 0x11f   :  { %214 = vadd.xlane.f32.xlu1 %v212_v41  ;;  %v213_v42 = vmul.f32 %v865_v40, %v865_v40 }
 0x121   :  { %210 = vadd.xlane.f32.xlu0 %v865_v40 }
 0x123   :  { %216 = vadd.xlane.f32.xlu1 %v213_v42 }
 0x1aa   :  { %v209_v57 = vpop.xlane.xlu0 %208 }
 0x1ab   :  { %v218_v58 = vmul.f32 0.03125, %v209_v57 }
 0x1ac   :  { %v215_v59 = vpop.xlane.xlu1 %214 }
 0x1ad   :  { %v222_v60 = vmul.f32 %v218_v58, %v218_v58  ;;  %v220_v61 = vmul.f32 0.03125, %v215_v59  ;;  %v226_v8 = vsub.f32 %v863_v37, %v218_v58 }
 0x1ae   :  { %v211_v62 = vpop.xlane.xlu0 %210 }
 0x1af   :  { %v224_v63 = vsub.f32 %v220_v61, %v222_v60  ;;  %v219_v1 = vmul.f32 0.03125, %v211_v62 }
 0x1b0   :  { %v217_v2 = vpop.xlane.xlu1 %216 }
 0x1b1   :  { %v228_v3 = vadd.f32 1e-05, %v224_v63  ;;  %v223_v4 = vmul.f32 %v219_v1, %v219_v1  ;;  %v221_v5 = vmul.f32 0.03125, %v217_v2  ;;  %v227_v12 = vsub.f32 %v865_v40, %v219_v1 }
 0x1b3   :  { %626 = vrsqrt.f32 %v228_v3  ;;  %v225_v6 = vsub.f32 %v221_v5, %v223_v4 }
 0x1b5   :  { %v229_v7 = vadd.f32 1e-05, %v225_v6 }
 0x1b7   :  { %628 = vrsqrt.f32 %v229_v7 }
 0x1bd   :  { %v627_v9 = vpop.eup %626 }
 0x1be   :  { %v232_v10 = vmul.f32 %v627_v9, %v226_v8 }
 0x1c0   :  { %v238_v15 = vmul.f32 %v504_v11, %v232_v10 }
 0x1c1   :  { %v629_v13 = vpop.eup %628 }
 0x1c2   :  { %v233_v14 = vmul.f32 %v629_v13, %v227_v12  ;;  %v244_v18 = vadd.f32 %v505_v16, %v238_v15 }
 0x1c4   :  { %v239_v17 = vmul.f32 %v504_v11, %v233_v14 }
 0x1c6   :  { %v245_v19 = vadd.f32 %v505_v16, %v239_v17 }
 0x1c8   :  { %v246_v20 = vpack.c.bf16 %v245_v19, %v244_v18 }
 0x1ca   :  { %573 = vmatmul.mubr.bf16.vlgmr.msra.gmra.mrb[0].mxu1 %v246_v20 }
 0x29d   :  { %v349_v24 = vpop.f32.mrb[0].mxu1 }
 0x29e   :  { %v350_v25 = vadd.f32 %v506_v23, %v349_v24  ;;  %v574_v26 = vpop.f32.mrb[1].mxu1 }
 0x29f   :  { %v352_v27 = vpop.f32.mrb[2].mxu1 }
 0x2a0   :  { %v353_v28 = vadd.f32 %v506_v23, %v352_v27  ;;  %v575_v29 = vpop.f32.mrb[3].mxu1  ;;  %v356_v30 = vmax.f32 %v350_v25, 0.0 }
 0x2a2   :  { %v357_v31 = vmax.f32 %v353_v28, 0.0 }
 0x2a4   :  { %v358_v32 = vpack.c.bf16 %v357_v31, %v356_v30 }
 0x2a6   :  { %593 = vmatmul.mubr.bf16.vlgmr.msra.gmra.mrb[4].mxu0 %v358_v32 }
 0x379   :  { %v461_v33 = vpop.f32.mrb[4].mxu0 }
 0x37a   :  { %v462_v34 = vadd.f32 %v515_v0, %v461_v33  ;;  %v594_v35 = vpop.f32.mrb[5].mxu0 }
 0x37b   :  { %v464_v36 = vpop.f32.mrb[6].mxu0 }
 0x37c   :  { %v468_v37 = vsub.f32 0.0, %v462_v34  ;;  %v465_v38 = vadd.f32 %v515_v0, %v464_v36  ;;  %v595_v39 = vpop.f32.mrb[7].mxu0 }
 0x37e   :  { %v470_v40 = vmul.f32 1.442695, %v468_v37  ;;  %v469_v41 = vsub.f32 0.0, %v465_v38 }
 0x380   :  { %630 = vpow2.f32 %v470_v40  ;;  %v472_v42 = vmul.f32 1.442695, %v469_v41 }
 0x382   :  { %632 = vpow2.f32 %v472_v42 }
 0x38a   :  { %v631_v43 = vpop.eup %630 }
 0x38b   :  { %v474_v44 = vadd.f32 1.0, %v631_v43 }
 0x38c   :  { %v633_v45 = vpop.eup %632 }
 0x38d   :  { %634 = vrcp.f32 %v474_v44  ;;  %v475_v46 = vadd.f32 1.0, %v633_v45 }
 0x38f   :  { %636 = vrcp.f32 %v475_v46 }
 0x397   :  { %v635_v47 = vpop.eup %634 }
 0x398   :  { %479 = vst.msk [vmem:[#allocation8] sm:$0xff] %vm478_vm3, %v635_v47 }
 0x399   :  { %v637_v48 = vpop.eup %636 }
 0x39a   :  { %480 = vst.msk [vmem:[#allocation8 + $0x8] sm:$0xff] %vm478_vm3, %v637_v48 }
 0x39b   :  { %485 = vsyncadd [#allocation4], 224  ;;  %s740_s4 = smov [#allocation8]  }
 0x39c   :  { %s486_s28 = sshll.u32 %s740_s4, 4  ;;  %s487_s28 = int_to_ptr.vmem [resolvable:$true] %s486_s28 }
 0x39d   :  { %s704_s1 = scalar_lea.vmem %s487_s28, 32  ;;  %s708_s21 = scalar_lea.vmem %s487_s28, 256 }
 0x39e   :  { %p705_p10 = scmp.ne.s32.totalorder %s487_s28, %s704_s1  ;;  %p709_p11 = scmp.lt.s32.totalorder %s487_s28, %s487_s28 }
 0x39f   :  { %p710_p12 = scmp.lt.s32.totalorder %s708_s21, %s704_s1 }
 0x3a1   :  { %p711_p13 = por %p710_p12, %p709_p11 }
 0x3a3   :  { %p712_p0 = pnand %p711_p13, %p705_p10 }
 0x3a5   :  { %715 = shalt.err (!%p712_p0)
}
 0x3a6   :  { %s716_s30 = scalar_lea.hbm %s918_s5, 32 }
 0x3a7   :  { %p717_p1 = scmp.ne.s32.totalorder %s918_s5, %s716_s30  ;;  %p720_p2 = scmp.lt.u32.totalorder %s716_s30, %s918_s5 }
 0x3a9   :  { %p722_p3 = pnand %p720_p2, %p717_p1 }
 0x3ab   :  { %725 = shalt.err (!%p722_p3)
}
 0x3ac   :  { %s741_s10 = smov 32   ;;  %s742_s11 = smov 2  }
 0x3ad   :  { %492 = dma.vmem_to_hbm [thread:$0]  %s487_s28, 32, %s918_s5, [#allocation4], %s741_s10, %s741_s10, %s742_s11  }
 0x3ae   :  { %730 = dma.done.wait [#allocation4], 256  }
 0x3af   :  { %731 = vsyncadd [#allocation4], 4294967040 }
 0x3b0   :  { %496 = vsyncpa [#allocation3], 1 }
 0x3b1   :  { %497 = vsyncpa [#allocation6], 1 }
 0x3b2   :  { %498 = vsyncpa [#allocation4], 1 }

</bundles_post_ra>
